<compile_context>
chip_gen: v7x
topology: tpu7x:2x2x1
jax: 0.10.0
libtpu: 0.0.40
codegen_flags: <defaults>
</compile_context>

<pallas_src>
import functools

import jax
import jax.numpy as jnp
from jax.experimental import pallas as pl
from jax.experimental.pallas import tpu as pltpu

_LANE = 128
_SUBLANE = 8
_NEG_INF = -1e30  # finite "minus infinity" bias for padded classes


def _round_up(x, m):
    return ((x + m - 1) // m) * m


def _choose_f_tiling(f, h, block_k):
    """Feature (K) tiling for fc1: one step while bf16 w1 is small, else split
    into TK-column chunks (TK multiple of 128)."""
    if f <= block_k or f * h * 2 <= (8 << 20):
        return f, f                       # (F_pad, TK): single K step, no pad
    return _round_up(f, block_k), block_k


def _choose_tb(b, block_b):
    """Batch tile: divide B exactly when possible (avoids a per-call jnp.pad of
    x) and produce >=2 grid steps when B allows so v7x's 2nd TC has work."""
    if b <= block_b:
        if b >= 2 * _SUBLANE and (b // 2) % _SUBLANE == 0:
            return b // 2                 # two tiles -> both v7x TensorCores
        return b                          # whole batch in one tile, no padding
    start = (block_b // _SUBLANE) * _SUBLANE
    for tb in range(start, 0, -_SUBLANE):
        if b % tb == 0:
            return tb                     # divides B -> no padding
    return start                          # fall back: pad B up to TB multiple


def _mlp_softmax_kernel(x_ref, w1_ref, b1_ref, w2_ref, b2_ref, o_ref, acc_ref):
    k = pl.program_id(1)

    @pl.when(k == 0)
    def _():
        acc_ref[...] = jnp.zeros_like(acc_ref)

    # fc1 partial product: x tile arrives as f32 (no wrapper cast / extra HBM
    # pass); cast to bf16 in VMEM right before the MXU. f32 accumulation.
    acc_ref[...] += jnp.dot(x_ref[...].astype(jnp.bfloat16), w1_ref[...],
                            preferred_element_type=jnp.float32)

    @pl.when(k == pl.num_programs(1) - 1)
    def _():
        # Bias + ReLU in f32, fc2 on the MXU, exact softmax epilogue.
        h = jnp.maximum(acc_ref[...] + b1_ref[...], 0.0)
        logits = jnp.dot(h.astype(w2_ref.dtype), w2_ref[...],
                         preferred_element_type=jnp.float32)
        logits = logits + b2_ref[...]     # padded classes carry a -1e30 bias
        m = jnp.max(logits, axis=-1, keepdims=True)
        e = jnp.exp(logits - m)
        denom = jnp.sum(e, axis=-1, keepdims=True)
        # Exact divide (kernel is DMA/MXU-bound, the VPU work is free) so
        # softmax rows normalize exactly, matching the PyTorch reference.
        o_ref[...] = (e / denom).astype(o_ref.dtype)


def prepare_params(w1, b1, w2, b2, *, block_k=2048):
    """One-time parameter prep (call OUTSIDE the jitted forward):
      * weights -> bf16 (no per-call HBM read/write for the cast),
      * class axis padded to a lane-dense multiple of 128 with -1e30 bias,
      * feature axis of w1 zero-padded to the K-tile size if fc1 is K-split.
    Returns (w1, b1, w2, b2) ready for disease_predictor_forward."""
    b1 = jnp.asarray(b1).reshape(1, -1)
    b2 = jnp.asarray(b2).reshape(1, -1)
    f, h = w1.shape
    c = w2.shape[1]

    f_pad, _ = _choose_f_tiling(f, h, block_k)
    if f_pad != f:
        w1 = jnp.pad(w1, ((0, f_pad - f), (0, 0)))

    c_pad = _round_up(max(c, _LANE), _LANE)
    if c_pad != c:
        w2 = jnp.pad(w2, ((0, 0), (0, c_pad - c)))
        b2 = jnp.concatenate(
            [b2, jnp.full((1, c_pad - c), _NEG_INF, b2.dtype)], axis=1)

    return (w1.astype(jnp.bfloat16), b1.astype(jnp.float32),
            w2.astype(jnp.bfloat16), b2.astype(jnp.float32))


@functools.partial(jax.jit,
                   static_argnames=("num_classes", "block_b", "block_k"))
def disease_predictor_forward(x, w1, b1, w2, b2, *, num_classes,
                              block_b=256, block_k=2048):
    """Forward pass of DiseasePredictor.

    x: [B, F] float32; (w1, b1, w2, b2) come from prepare_params.
    Returns softmax probabilities [B, num_classes] float32.
    """
    B = x.shape[0]
    F_pad, H = w1.shape
    C_pad = w2.shape[1]

    # ---- batch tiling (no jnp.pad of x when TB divides B) ------------------
    TB = _choose_tb(B, block_b)           # v5e: pass block_b=128 for large F
    B_pad = _round_up(B, TB)
    if B_pad != B:
        x = jnp.pad(x, ((0, B_pad - B), (0, 0)))

    # ---- feature (K) tiling for fc1 ----------------------------------------
    _, TK = _choose_f_tiling(F_pad, H, block_k)
    if x.shape[1] != F_pad:               # zero-pad features to the K grid
        x = jnp.pad(x, ((0, 0), (0, F_pad - x.shape[1])))
    nb, nk = B_pad // TB, F_pad // TK

    cost = pl.CostEstimate(
        flops=2 * B_pad * (F_pad * H + H * C_pad),
        transcendentals=B_pad * C_pad,
        bytes_accessed=(4 * B_pad * F_pad            # x (f32, cast in-kernel)
                        + 2 * (F_pad * H + H * C_pad)  # bf16 weights
                        + 4 * (H + C_pad)              # f32 biases
                        + 4 * B_pad * C_pad),          # f32 output
    )

    resident = pl.Buffered(1)  # constant-index blocks: no double-buffering
    if nk == 1:
        w1_spec = pl.BlockSpec((TK, H), lambda i, k: (k, 0),
                               pipeline_mode=resident)
    else:
        # K-tiles change each step -> keep default 2-deep pipelining.
        w1_spec = pl.BlockSpec((TK, H), lambda i, k: (k, 0))

    out = pl.pallas_call(
        _mlp_softmax_kernel,
        out_shape=jax.ShapeDtypeStruct((B_pad, C_pad), jnp.float32),
        grid=(nb, nk),
        in_specs=[
            pl.BlockSpec((TB, TK), lambda i, k: (i, k)),   # x tile (f32)
            w1_spec,                                       # w1 K-tiles (bf16)
            pl.BlockSpec((1, H), lambda i, k: (0, 0),
                         pipeline_mode=resident),          # b1 (resident)
            pl.BlockSpec((H, C_pad), lambda i, k: (0, 0),
                         pipeline_mode=resident),          # w2 (resident)
            pl.BlockSpec((1, C_pad), lambda i, k: (0, 0),
                         pipeline_mode=resident),          # b2 (resident)
        ],
        out_specs=pl.BlockSpec((TB, C_pad), lambda i, k: (i, 0)),
        scratch_shapes=[pltpu.VMEM((TB, H), jnp.float32)],  # fc1 accumulator
        compiler_params=pltpu.CompilerParams(
            dimension_semantics=("parallel", "arbitrary")),
        cost_estimate=cost,
    )(x, w1, b1, w2, b2)

    return out[:B, :num_classes]


def init_params(key, input_size, hidden_size, output_size):
    k1, k2, k3, k4 = jax.random.split(key, 4)
    # Match PyTorch nn.Linear default init U(-1/sqrt(fan_in), 1/sqrt(fan_in)).
    s1 = 1.0 / jnp.sqrt(input_size)
    s2 = 1.0 / jnp.sqrt(hidden_size)
    w1 = jax.random.uniform(k1, (input_size, hidden_size), jnp.float32, -s1, s1)
    b1 = jax.random.uniform(k2, (1, hidden_size), jnp.float32, -s1, s1)
    w2 = jax.random.uniform(k3, (hidden_size, output_size), jnp.float32, -s2, s2)
    b2 = jax.random.uniform(k4, (1, output_size), jnp.float32, -s2, s2)
    return w1, b1, w2, b2


if __name__ == "__main__":
    # Small synthetic shapes consistent with the module:
    # input_size = num TF-IDF features, output_size = num disease classes.
    batch = 8
    input_size = 256
    hidden_size = 128
    output_size = 16

    key = jax.random.PRNGKey(0)
    kx, kp = jax.random.split(key)
    x = jax.random.uniform(kx, (batch, input_size), jnp.float32)
    w1, b1, w2, b2 = init_params(kp, input_size, hidden_size, output_size)

    params = prepare_params(w1, b1, w2, b2)        # once, outside jit
    out = disease_predictor_forward(x, *params, num_classes=output_size)
    out = jax.block_until_ready(out)

    # Pure-JAX f32 reference for correctness.
    ref = jax.nn.softmax(jnp.maximum(x @ w1 + b1, 0.0) @ w2 + b2, axis=1)

    assert out.shape == (batch, output_size)
    assert bool(jnp.all(jnp.isfinite(out)))
    assert bool(jnp.all(out >= 0.0))
    row_sums = jnp.sum(out, axis=1)
    assert bool(jnp.all(jnp.abs(row_sums - 1.0) < 1e-4))   # exact softmax divide
    # bf16 MXU inputs (f32 accumulation) -> loose tolerance vs. f32 reference.
    assert bool(jnp.max(jnp.abs(out - ref)) < 2e-2)

    print("KERNEL_OK")
</pallas_src>

<mosaic_0001>
module attributes {stable_mosaic.version = 11 : i64} {
  func.func @_mlp_softmax_kernel(%arg0: i32, %arg1: i32, %arg2: memref<8x256xf32, #tpu.memory_space<vmem>>, %arg3: memref<256x128xbf16, #tpu.memory_space<vmem>>, %arg4: memref<1x128xf32, #tpu.memory_space<vmem>>, %arg5: memref<128x128xbf16, #tpu.memory_space<vmem>>, %arg6: memref<1x128xf32, #tpu.memory_space<vmem>>, %arg7: memref<8x128xf32, #tpu.memory_space<vmem>>, %arg8: memref<8x128xf32, #tpu.memory_space<vmem>>) attributes {dimension_semantics = [#tpu.dimension_semantics<parallel>, #tpu.dimension_semantics<arbitrary>], iteration_bounds = array<i64: 1, 1>, scalar_prefetch = 0 : i64, scratch_operands = 1 : i64, tpu.core_type = #tpu.core_type<tc>, window_params = [{transform_indices = @transform_0, window_bounds = array<i64: 8, 256>}, {pipeline_mode = #tpu.pipeline_mode<synchronous>, transform_indices = @transform_1, window_bounds = array<i64: 256, 128>}, {pipeline_mode = #tpu.pipeline_mode<synchronous>, transform_indices = @transform_2, window_bounds = array<i64: 1, 128>}, {pipeline_mode = #tpu.pipeline_mode<synchronous>, transform_indices = @transform_3, window_bounds = array<i64: 128, 128>}, {pipeline_mode = #tpu.pipeline_mode<synchronous>, transform_indices = @transform_4, window_bounds = array<i64: 1, 128>}, {transform_indices = @transform_5, window_bounds = array<i64: 8, 128>}]} {
    %c0_i32 = arith.constant 0 : i32
    %0 = arith.cmpi eq, %arg1, %c0_i32 : i32
    %1 = arith.extui %0 : i1 to i32
    %c0_i32_0 = arith.constant 0 : i32
    %2 = arith.cmpi ne, %1, %c0_i32_0 : i32
    scf.if %2 {
      %cst_10 = arith.constant 0.000000e+00 : f32
      %13 = vector.broadcast %cst_10 : f32 to vector<8x128xf32>
      %c0_11 = arith.constant 0 : index
      %c0_12 = arith.constant 0 : index
      %14 = vector.load %arg8[%c0_11, %c0_12] : memref<8x128xf32, #tpu.memory_space<vmem>>, vector<8x128xf32>
      tpu.vector_store %arg8[%c0_11, %c0_12], %13 {strides = array<i32>} : memref<8x128xf32, #tpu.memory_space<vmem>>, vector<8x128xf32>,
    } else {
    }
    %c0 = arith.constant 0 : index
    %c0_1 = arith.constant 0 : index
    %3 = vector.load %arg8[%c0, %c0_1] : memref<8x128xf32, #tpu.memory_space<vmem>>, vector<8x128xf32>
    %c0_2 = arith.constant 0 : index
    %c0_3 = arith.constant 0 : index
    %4 = vector.load %arg2[%c0_2, %c0_3] : memref<8x256xf32, #tpu.memory_space<vmem>>, vector<8x256xf32>
    %5 = arith.truncf %4 : vector<8x256xf32> to vector<8x256xbf16>
    %c0_4 = arith.constant 0 : index
    %c0_5 = arith.constant 0 : index
    %6 = vector.load %arg3[%c0_4, %c0_5] : memref<256x128xbf16, #tpu.memory_space<vmem>>, vector<256x128xbf16>
    %cst = arith.constant dense<0.000000e+00> : vector<8x128xf32>
    %7 = tpu.matmul %5, %6, %cst {dimension_numbers = #tpu.dot_dimension_numbers<[1], [0], [0], [1], [0, 0, 1, 1], [], []>} : vector<8x256xbf16>, vector<256x128xbf16>, vector<8x128xf32> -> vector<8x128xf32>
    %8 = arith.addf %3, %7 : vector<8x128xf32>
    %c0_6 = arith.constant 0 : index
    %c0_7 = arith.constant 0 : index
    %9 = vector.load %arg8[%c0_6, %c0_7] : memref<8x128xf32, #tpu.memory_space<vmem>>, vector<8x128xf32>
    tpu.vector_store %arg8[%c0_6, %c0_7], %8 {strides = array<i32>} : memref<8x128xf32, #tpu.memory_space<vmem>>, vector<8x128xf32>,
    %c0_i32_8 = arith.constant 0 : i32
    %10 = arith.cmpi eq, %arg1, %c0_i32_8 : i32
    %11 = arith.extui %10 : i1 to i32
    %c0_i32_9 = arith.constant 0 : i32
    %12 = arith.cmpi ne, %11, %c0_i32_9 : i32
    scf.if %12 {
      %c0_10 = arith.constant 0 : index
      %c0_11 = arith.constant 0 : index
      %13 = vector.load %arg8[%c0_10, %c0_11] : memref<8x128xf32, #tpu.memory_space<vmem>>, vector<8x128xf32>
      %c0_12 = arith.constant 0 : index
      %c0_13 = arith.constant 0 : index
      %14 = vector.load %arg4[%c0_12, %c0_13] : memref<1x128xf32, #tpu.memory_space<vmem>>, vector<1x128xf32>
      %15 = vector.broadcast %14 : vector<1x128xf32> to vector<8x128xf32>
      %16 = arith.addf %13, %15 : vector<8x128xf32>
      %cst_14 = arith.constant 0.000000e+00 : f32
      %17 = vector.broadcast %cst_14 : f32 to vector<8x128xf32>
      %18 = arith.maximumf %16, %17 : vector<8x128xf32>
      %19 = arith.truncf %18 : vector<8x128xf32> to vector<8x128xbf16>
      %c0_15 = arith.constant 0 : index
      %c0_16 = arith.constant 0 : index
      %20 = vector.load %arg5[%c0_15, %c0_16] : memref<128x128xbf16, #tpu.memory_space<vmem>>, vector<128x128xbf16>
      %cst_17 = arith.constant dense<0.000000e+00> : vector<8x128xf32>
      %21 = tpu.matmul %19, %20, %cst_17 {dimension_numbers = #tpu.dot_dimension_numbers<[1], [0], [0], [1], [0, 0, 1, 1], [], []>} : vector<8x128xbf16>, vector<128x128xbf16>, vector<8x128xf32> -> vector<8x128xf32>
      %c0_18 = arith.constant 0 : index
      %c0_19 = arith.constant 0 : index
      %22 = vector.load %arg6[%c0_18, %c0_19] : memref<1x128xf32, #tpu.memory_space<vmem>>, vector<1x128xf32>
      %23 = vector.broadcast %22 : vector<1x128xf32> to vector<8x128xf32>
      %24 = arith.addf %21, %23 : vector<8x128xf32>
      %cst_20 = arith.constant dense<0xFF800000> : vector<8xf32>
      %25 = vector.multi_reduction <maximumf>, %24, %cst_20 [1] : vector<8x128xf32> to vector<8xf32>
      %26 = vector.shape_cast %25 : vector<8xf32> to vector<8x1xf32>
      %27 = vector.broadcast %26 : vector<8x1xf32> to vector<8x128xf32>
      %28 = arith.subf %24, %27 : vector<8x128xf32>
      %29 = math.exp %28 : vector<8x128xf32>
      %cst_21 = arith.constant dense<0.000000e+00> : vector<8xf32>
      %30 = vector.multi_reduction <add>, %29, %cst_21 [1] : vector<8x128xf32> to vector<8xf32>
      %31 = vector.shape_cast %30 : vector<8xf32> to vector<8x1xf32>
      %32 = vector.broadcast %31 : vector<8x1xf32> to vector<8x128xf32>
      %33 = arith.divf %29, %32 : vector<8x128xf32>
      %c0_22 = arith.constant 0 : index
      %c0_23 = arith.constant 0 : index
      %34 = vector.load %arg7[%c0_22, %c0_23] : memref<8x128xf32, #tpu.memory_space<vmem>>, vector<8x128xf32>
      tpu.vector_store %arg7[%c0_22, %c0_23], %33 {strides = array<i32>} : memref<8x128xf32, #tpu.memory_space<vmem>>, vector<8x128xf32>,
    } else {
    }
    return
  }
  func.func @transform_0(%arg0: i32, %arg1: i32) -> (i32, i32) {
    %c0_i32 = arith.constant 0 : i32
    return %arg0, %arg1 : i32, i32
  }
  func.func @transform_1(%arg0: i32, %arg1: i32) -> (i32, i32) {
    %c0_i32 = arith.constant 0 : i32
    %c0_i32_0 = arith.constant 0 : i32
    return %arg1, %c0_i32 : i32, i32
  }
  func.func @transform_2(%arg0: i32, %arg1: i32) -> (i32, i32) {
    %c0_i32 = arith.constant 0 : i32
    %c0_i32_0 = arith.constant 0 : i32
    %c0_i32_1 = arith.constant 0 : i32
    return %c0_i32, %c0_i32_0 : i32, i32
  }
  func.func @transform_3(%arg0: i32, %arg1: i32) -> (i32, i32) {
    %c0_i32 = arith.constant 0 : i32
    %c0_i32_0 = arith.constant 0 : i32
    %c0_i32_1 = arith.constant 0 : i32
    return %c0_i32, %c0_i32_0 : i32, i32
  }
  func.func @transform_4(%arg0: i32, %arg1: i32) -> (i32, i32) {
    %c0_i32 = arith.constant 0 : i32
    %c0_i32_0 = arith.constant 0 : i32
    %c0_i32_1 = arith.constant 0 : i32
    return %c0_i32, %c0_i32_0 : i32, i32
  }
  func.func @transform_5(%arg0: i32, %arg1: i32) -> (i32, i32) {
    %c0_i32 = arith.constant 0 : i32
    %c0_i32_0 = arith.constant 0 : i32
    return %arg0, %c0_i32 : i32, i32
  }
}

</mosaic_0001>

<bundles_post_ra>
// kernel: disease_predictor_forward.1
= control target key start
LH: loop header
LB: loop body
LE: loop exit
PB: predicated region body
PF: predicated region fallthrough
CT: control target
= control target key end

     0   :  { %10 = vsyncpa [#allocation4], 0  ;;  %s706_s0 = inlined_call_operand.hbm [shape: f32[8,256], index: 0, kind: input, shape index: {}]   ;;  %s707_s1 = inlined_call_operand.hbm [shape: bf16[256,128], index: 1, kind: input, shape index: {}]   ;;  %s708_s2 = inlined_call_operand.vmem [shape: f32[1,128], index: 2, kind: input, shape index: {}]   ;;  %s709_s3 = inlined_call_operand.hbm [shape: bf16[128,128], index: 3, kind: input, shape index: {}]   ;;  %s710_s4 = inlined_call_operand.vmem [shape: f32[1,128], index: 4, kind: input, shape index: {}]   ;;  %s711_s5 = inlined_call_operand.hbm [shape: f32[8,128], index: 5, kind: output, shape index: {}]  }
   0x1   :  { %11 = vsyncpa [#allocation7], 0 }
   0x2   :  { %12 = vsyncpa [#allocation5], 0  ;;  %s599_s18 = smov [#allocation6]   ;;  %s505_s22 = scalar_lea.hbm %s707_s1, 2048 }
   0x3   :  { %s28_s19 = sshll.u32 %s599_s18, 4  ;;  %p506_p0 = scmp.ne.s32.totalorder %s707_s1, %s505_s22  ;;  %s29_s19 = int_to_ptr.vmem [resolvable:$true] %s28_s19 }
   0x4   :  { %p509_p1 = scmp.lt.u32.totalorder %s505_s22, %s707_s1 }
   0x6   :  { %p511_p2 = pnand %p509_p1, %p506_p0 }
   0x8   :  { %514 = shalt.err (!%p511_p2)
}
   0x9   :  { %s515_s27 = scalar_lea.vmem %s29_s19, 2048  ;;  %p520_p4 = scmp.lt.s32.totalorder %s29_s19, %s29_s19 }
   0xa   :  { %p516_p3 = scmp.ne.s32.totalorder %s29_s19, %s515_s27  ;;  %p521_p5 = scmp.lt.s32.totalorder %s515_s27, %s515_s27 }
   0xc   :  { %p522_p6 = por %p521_p5, %p520_p4 }
   0xe   :  { %p523_p7 = pnand %p522_p6, %p516_p3 }
  0x10   :  { %526 = shalt.err (!%p523_p7)
}
  0x11   :  { %s600_s28 = smov 64   ;;  %s601_s29 = smov 4  }
  0x12   :  { %34 = dma.hbm_to_vmem [thread:$0]  %s707_s1, 2048, %s29_s19, [#allocation7], %s600_s28, %s600_s28, %s601_s29  }
  0x13   :  { %s602_s7 = smov [#allocation3]   ;;  %s603_s9 = smov [#allocation8]  }
  0x14   :  { %s19_s8 = sshll.u32 %s602_s7, 4  ;;  %s42_s10 = sshll.u32 %s603_s9, 4  ;;  %s20_s8 = int_to_ptr.vmem [resolvable:$true] %s19_s8  ;;  %s43_s10 = int_to_ptr.vmem [resolvable:$true] %s42_s10 }
  0x15   :  { %s527_s13 = scalar_lea.hbm %s706_s0, 256 }
  0x16   :  { %p528_p8 = scmp.ne.s32.totalorder %s706_s0, %s527_s13  ;;  %p531_p9 = scmp.lt.u32.totalorder %s527_s13, %s706_s0 }
  0x18   :  { %p533_p10 = pnand %p531_p9, %p528_p8 }
  0x1a   :  { %536 = shalt.err (!%p533_p10)
}
  0x1b   :  { %s537_s1 = scalar_lea.vmem %s20_s8, 256  ;;  %p542_p12 = scmp.lt.s32.totalorder %s20_s8, %s20_s8 }
  0x1c   :  { %p538_p11 = scmp.ne.s32.totalorder %s20_s8, %s537_s1  ;;  %p543_p13 = scmp.lt.s32.totalorder %s537_s1, %s537_s1 }
  0x1e   :  { %p544_p0 = por %p543_p13, %p542_p12 }
  0x20   :  { %p545_p1 = pnand %p544_p0, %p538_p11 }
  0x22   :  { %548 = shalt.err (!%p545_p1)
}
  0x23   :  { %22 = dma.hbm_to_vmem [thread:$0]  %s706_s0, 256, %s20_s8, [#allocation4]  }
  0x24   :  { %s549_s22 = scalar_lea.hbm %s709_s3, 1024 }
  0x25   :  { %p550_p2 = scmp.ne.s32.totalorder %s709_s3, %s549_s22  ;;  %p553_p3 = scmp.lt.u32.totalorder %s549_s22, %s709_s3 }
  0x27   :  { %p555_p4 = pnand %p553_p3, %p550_p2 }
  0x29   :  { %558 = shalt.err (!%p555_p4)
}
  0x2a   :  { %s559_s27 = scalar_lea.vmem %s43_s10, 1024  ;;  %p564_p6 = scmp.lt.s32.totalorder %s43_s10, %s43_s10 }
  0x2b   :  { %p560_p5 = scmp.ne.s32.totalorder %s43_s10, %s559_s27  ;;  %p565_p7 = scmp.lt.s32.totalorder %s559_s27, %s559_s27 }
  0x2d   :  { %p566_p8 = por %p565_p7, %p564_p6 }
  0x2f   :  { %p567_p9 = pnand %p566_p8, %p560_p5 }
  0x31   :  { %570 = shalt.err (!%p567_p9)
}
  0x32   :  { %48 = dma.hbm_to_vmem [thread:$0]  %s709_s3, 1024, %s43_s10, [#allocation7], %s600_s28, %s600_s28, %s601_s29  }
  0x33   :  { %593 = dma.done.wait [#allocation4], 256  }
  0x34   :  { %594 = vsyncadd [#allocation4], 4294967040 }
  0x35   :  { %595 = dma.done.wait [#allocation7], 3072  }
  0x36   :  { %596 = vsyncadd [#allocation7], 4294964224  ;;  %v604_v0 = vmov 0.0   ;;  %v477_v1 = vld [vmem:[#allocation6 + $0x40] sm:$0xff]   ;;  %v479_v3 = vld [vmem:[#allocation6 + $0x48] sm:$0xff]   ;;  %vm605_vm0 = vmmov 0  }
  0x37   :  { %449 = vmatprep.subr.bf16.mxu1 %v604_v0  ;;  %v478_v2 = vld [vmem:[#allocation6] sm:$0xff]   ;;  %418 = vmatprep.subr.bf16.mxu0 %v477_v1  ;;  %v480_v4 = vld [vmem:[#allocation6 + $0x8] sm:$0xff]   ;;  %v481_v5 = vld [vmem:[#allocation6 + $0x50] sm:$0xff]  }
  0x38   :  { %419 = vmatpush3.bf16.msra.mxu0 %v478_v2  ;;  %v482_v6 = vld [vmem:[#allocation6 + $0x10] sm:$0xff]   ;;  %v483_v7 = vld [vmem:[#allocation6 + $0x58] sm:$0xff]   ;;  %v485_v9 = vld [vmem:[#allocation6 + $0x60] sm:$0xff]   ;;  %465 = vmatprep.mubr.msk.bf16.mxu1 %vm605_vm0, %v604_v0 }
  0x39   :  { %420 = vmatprep.subr.bf16.mxu0 %v479_v3  ;;  %v484_v8 = vld [vmem:[#allocation6 + $0x18] sm:$0xff]   ;;  %v486_v10 = vld [vmem:[#allocation6 + $0x20] sm:$0xff]   ;;  %v487_v11 = vld [vmem:[#allocation6 + $0x68] sm:$0xff]  }
  0x3a   :  { %v68_v12 = vld [vmem:[#allocation3 + $0x8] sm:$0xff]  ;;  %v493_v14 = vld [vmem:[#allocation8] sm:$0xff]   ;;  %v488_v15 = vld [vmem:[#allocation6 + $0x28] sm:$0xff]  }
  0x3b   :  { %v70_v13 = vpack.c.bf16 %v68_v12, %v68_v12  ;;  %v489_v16 = vld [vmem:[#allocation6 + $0x70] sm:$0xff]   ;;  %450 = vmatpush3.bf16.msra.mxu1 %v493_v14  ;;  %v494_v17 = vld [vmem:[#allocation8 + $0x8] sm:$0xff]   ;;  %v491_v19 = vld [vmem:[#allocation6 + $0x78] sm:$0xff]  }
  0x3c   :  { %421 = vmatpush3.bf16.msra.mxu0 %v480_v4  ;;  %451 = vmatprep.subr.bf16.mxu1 %v604_v0  ;;  %v490_v18 = vld [vmem:[#allocation6 + $0x30] sm:$0xff]   ;;  %v492_v21 = vld [vmem:[#allocation6 + $0x38] sm:$0xff]   ;;  %v497_v25 = vld [vmem:[#allocation8 + $0x20] sm:$0xff]  }
  0x3d   :  { %422 = vmatprep.subr.bf16.mxu0 %v481_v5  ;;  %231 = vmatprep.mubr.bf16.mxu0 %v70_v13  ;;  %v495_v20 = vld [vmem:[#allocation8 + $0x10] sm:$0xff]   ;;  %v496_v23 = vld [vmem:[#allocation8 + $0x18] sm:$0xff]   ;;  %v498_v26 = vld [vmem:[#allocation8 + $0x28] sm:$0xff]  }
  0x3e   :  { %v67_v22 = vld [vmem:[#allocation3] sm:$0xff]  ;;  %v500_v28 = vld [vmem:[#allocation8 + $0x38] sm:$0xff]  }
  0x3f   :  { %452 = vmatpush3.bf16.msra.mxu1 %v494_v17  ;;  %v69_v24 = vpack.c.bf16 %v67_v22, %v67_v22  ;;  %v499_v27 = vld [vmem:[#allocation8 + $0x30] sm:$0xff]  }
  0x40   :  { %423 = vmatpush3.bf16.msra.mxu0 %v482_v6  ;;  %453 = vmatprep.subr.bf16.mxu1 %v604_v0  ;;  %v408_v31 = vld [vmem:[%s708_s2] ss:$0 sm:$0xff]  ;;  %s606_s2 = smov [#allocation9]  }
  0x41   :  { %424 = vmatprep.subr.bf16.mxu0 %v483_v7  ;;  %v409_v38 = vld [vmem:[%s710_s4] ss:$0 sm:$0xff]  ;;  %s382_s7 = sshll.u32 %s606_s2, 4  ;;  %s383_s7 = int_to_ptr.vmem [resolvable:$true] %s382_s7 }
  0x42   :  { %s571_s4 = scalar_lea.vmem %s383_s7, 128  ;;  %p576_p11 = scmp.lt.s32.totalorder %s383_s7, %s383_s7 }
  0x43   :  { %454 = vmatpush3.bf16.msra.mxu1 %v495_v20  ;;  %p572_p10 = scmp.ne.s32.totalorder %s383_s7, %s571_s4  ;;  %p577_p12 = scmp.lt.s32.totalorder %s571_s4, %s571_s4 }
  0x44   :  { %425 = vmatpush3.bf16.msra.mxu0 %v484_v8  ;;  %455 = vmatprep.subr.bf16.mxu1 %v604_v0 }
  0x45   :  { %426 = vmatprep.subr.bf16.mxu0 %v485_v9  ;;  %p578_p13 = por %p577_p12, %p576_p11 }
  0x47   :  { %456 = vmatpush3.bf16.msra.mxu1 %v496_v23  ;;  %p579_p0 = pnand %p578_p13, %p572_p10 }
  0x48   :  { %427 = vmatpush3.bf16.msra.mxu0 %v486_v10  ;;  %457 = vmatprep.subr.bf16.mxu1 %v604_v0 }
  0x49   :  { %428 = vmatprep.subr.bf16.mxu0 %v487_v11 }
  0x4b   :  { %458 = vmatpush3.bf16.msra.mxu1 %v497_v25 }
  0x4c   :  { %429 = vmatpush3.bf16.msra.mxu0 %v488_v15  ;;  %459 = vmatprep.subr.bf16.mxu1 %v604_v0 }
  0x4d   :  { %430 = vmatprep.subr.bf16.mxu0 %v489_v16 }
  0x4f   :  { %460 = vmatpush3.bf16.msra.mxu1 %v498_v26 }
  0x50   :  { %431 = vmatpush3.bf16.msra.mxu0 %v490_v18  ;;  %461 = vmatprep.subr.bf16.mxu1 %v604_v0 }
  0x51   :  { %432 = vmatprep.subr.bf16.mxu0 %v491_v19 }
  0x53   :  { %462 = vmatpush3.bf16.msra.mxu1 %v499_v27 }
  0x54   :  { %433 = vmatpush3.bf16.msra.mxu0 %v492_v21  ;;  %463 = vmatprep.subr.bf16.mxu1 %v604_v0 }
  0x57   :  { %232 = vmatmul.mubr.bf16.vlgmr.msra.gmra.mrb[0].mxu0 %v69_v24  ;;  %464 = vmatpush3.bf16.msra.mxu1 %v500_v28 }
 0x12a   :  { %v434_v29 = vpop.f32.mrb[0].mxu0 }
 0x12b   :  { %v435_v30 = vpop.f32.mrb[1].mxu0 }
 0x12c   :  { %v436_v32 = vadd.f32 %v435_v30, %v434_v29  ;;  %v437_v33 = vpop.f32.mrb[2].mxu0 }
 0x12d   :  { %v438_v34 = vpop.f32.mrb[3].mxu0 }
 0x12e   :  { %v252_v35 = vadd.f32 %v436_v32, %v408_v31 }
 0x130   :  { %v253_v36 = vmax.f32 %v252_v35, 0.0 }
 0x132   :  { %v254_v37 = vpack.c.bf16 %v253_v36, %v253_v36 }
 0x134   :  { %466 = vmatmul.mubr.bf16.vlgmr.msra.gmra.mrb[0].mxu1 %v254_v37 }
 0x207   :  { %v360_v39 = vpop.f32.mrb[0].mxu1 }
 0x208   :  { %v361_v40 = vadd.f32 %v409_v38, %v360_v39  ;;  %v467_v41 = vpop.f32.mrb[1].mxu1 }
 0x209   :  { %v363_v42 = vpop.f32.mrb[2].mxu1 }
 0x20a   :  { %366 = vmax.xlane.f32.xlu0 %v361_v40  ;;  %v468_v43 = vpop.f32.mrb[3].mxu1 }
 0x297   :  { %v367_v44 = vpop.xlane.xlu0 %366 }
 0x298   :  { %v368_v45 = vsub.f32 %v361_v40, %v367_v44 }
 0x29a   :  { %v369_v46 = vmul.f32 1.442695, %v368_v45 }
 0x29c   :  { %501 = vpow2.f32 %v369_v46 }
 0x2a6   :  { %v502_v47 = vpop.eup %501 }
 0x2a7   :  { %371 = vadd.xlane.f32.xlu0 %v502_v47 }
 0x334   :  { %v372_v48 = vpop.xlane.xlu0 %371 }
 0x335   :  { %503 = vrcp.f32 %v372_v48 }
 0x33f   :  { %v504_v49 = vpop.eup %503 }
 0x340   :  { %v374_v50 = vmul.f32 %v504_v49, %v502_v47 }
 0x342   :  { %375 = vst [vmem:[#allocation9] sm:$0xff] %v374_v50 }
 0x343   :  { %582 = shalt.err (!%p579_p0)
}
 0x344   :  { %s583_s10 = scalar_lea.hbm %s711_s5, 128 }
 0x345   :  { %p584_p1 = scmp.ne.s32.totalorder %s711_s5, %s583_s10  ;;  %p587_p2 = scmp.lt.u32.totalorder %s583_s10, %s711_s5 }
 0x347   :  { %p589_p3 = pnand %p587_p2, %p584_p1 }
 0x349   :  { %592 = shalt.err (!%p589_p3)
}
 0x34a   :  { %385 = dma.vmem_to_hbm [thread:$0]  %s383_s7, 128, %s711_s5, [#allocation5]  }
 0x34b   :  { %597 = dma.done.wait [#allocation5], 128  }
 0x34c   :  { %598 = vsyncadd [#allocation5], 4294967168 }
 0x34d   :  { %389 = vsyncpa [#allocation4], 1 }
 0x34e   :  { %390 = vsyncpa [#allocation7], 1 }
 0x34f   :  { %391 = vsyncpa [#allocation5], 1 }

</bundles_post_ra>
